<compile_context>
chip_gen: v7x
topology: tpu7x:2x2x1
jax: 0.10.0
libtpu: 0.0.40
codegen_flags: <defaults>
</compile_context>

<pallas_src>
import functools

import jax
import jax.numpy as jnp
from jax.experimental import pallas as pl
from jax.experimental.pallas import tpu as pltpu


def _round_up(x: int, m: int) -> int:
    return ((x + m - 1) // m) * m


def _pick_block_cols(batch: int, d: int, itemsize: int,
                     target_bytes: int = 2 * 1024 * 1024) -> int:
    """Lane-aligned column tile sized to ~target_bytes per input block."""
    d_pad = _round_up(max(d, 1), 128)
    max_cols = max(128, (target_bytes // max(batch * itemsize, 1)) // 128 * 128)
    return min(d_pad, max_cols)


def _gram_kernel(x_ref, out_ref, *, d_total, block_cols):
    i = pl.program_id(0)
    x = x_ref[...].astype(jnp.float32)          # upcast on the VPU (bf16-friendly)
    # Zero out-of-range columns of the (possibly padded) last tile.
    col = i * block_cols + jax.lax.broadcasted_iota(jnp.int32, x.shape, 1)
    x = jnp.where(col < d_total, x, 0.0)
    # (B, tk) contracted with itself over columns -> (B, B) partial Gram (MXU).
    out_ref[...] = jax.lax.dot_general(
        x, x, (((1,), (1,)), ((), ())),
        preferred_element_type=jnp.float32,
        precision=jax.lax.Precision.HIGHEST,
    )


def _gram(x: jax.Array, block_cols=None) -> jax.Array:
    """Return X @ X.T (float32, shape (B, B)) for x of shape (B, D)."""
    b, d = x.shape
    itemsize = jnp.dtype(x.dtype).itemsize
    if block_cols is None:
        block_cols = _pick_block_cols(b, d, itemsize)
    block_cols = max(128, _round_up(int(block_cols), 128))
    num_blocks = (d + block_cols - 1) // block_cols  # pl.cdiv, as a Python int

    kernel = functools.partial(_gram_kernel, d_total=d, block_cols=block_cols)
    partials = pl.pallas_call(
        kernel,
        out_shape=jax.ShapeDtypeStruct((num_blocks, b, b), jnp.float32),
        grid_spec=pltpu.PrefetchScalarGridSpec(
            num_scalar_prefetch=0,
            grid=(num_blocks,),
            in_specs=[pl.BlockSpec((b, block_cols), lambda i: (0, i))],
            # Per-step partial output (first dim squeezed) -> no resident
            # accumulator, so the grid axis can be sharded across TensorCores.
            out_specs=pl.BlockSpec((None, b, b), lambda i: (i, 0, 0)),
        ),
        compiler_params=pltpu.CompilerParams(
            dimension_semantics=("parallel",),
            vmem_limit_bytes=32 * 1024 * 1024,
        ),
        cost_estimate=pl.CostEstimate(
            flops=2 * b * b * d,
            transcendentals=0,
            bytes_accessed=b * d * itemsize + num_blocks * b * b * 4,
        ),
    )(x)
    # Tiny (num_blocks, B, B) reduction done in the wrapper (keeps the kernel's
    # grid axis "parallel"; cost is negligible).
    return jnp.sum(partials, axis=0)


def loss_orth(input1: jax.Array, input2: jax.Array, *, block_cols=None) -> jax.Array:
    """LossOrth forward: mean((normalize(x1).T @ normalize(x2))**2)."""
    b = input1.shape[0]
    x1 = input1.reshape(b, -1)
    x2 = input2.reshape(b, -1)
    d1, d2 = x1.shape[1], x2.shape[1]
    eps = jnp.float32(1e-6)

    a = _gram(x1, block_cols)   # (B, B) = x1 @ x1.T   (heavy HBM streaming, Pallas)
    c = _gram(x2, block_cols)   # (B, B) = x2 @ x2.T

    # O(B^2) epilogue: row norms come for free as sqrt(diag(Gram)).
    inv1 = 1.0 / (jnp.sqrt(jnp.diagonal(a)) + eps)
    inv2 = 1.0 / (jnp.sqrt(jnp.diagonal(c)) + eps)
    a_n = a * inv1[:, None] * inv1[None, :]
    c_n = c * inv2[:, None] * inv2[None, :]
    return jnp.sum(a_n * c_n) / jnp.float32(d1 * d2)


def _loss_orth_ref(input1, input2):
    """Direct JAX mirror of the PyTorch forward (materializes the D1 x D2 matrix)."""
    b = input1.shape[0]
    x1 = input1.reshape(b, -1).astype(jnp.float32)
    x2 = input2.reshape(b, -1).astype(jnp.float32)
    n1 = jnp.linalg.norm(x1, axis=1, keepdims=True)
    n2 = jnp.linalg.norm(x2, axis=1, keepdims=True)
    x1n = x1 / (n1 + 1e-6)
    x2n = x2 / (n2 + 1e-6)
    g = jnp.matmul(x1n.T, x2n, precision=jax.lax.Precision.HIGHEST)
    return jnp.mean(g * g)


if __name__ == "__main__":
    key = jax.random.PRNGKey(0)
    k1, k2 = jax.random.split(key)

    # Two feature tensors sharing the batch dim, as the module implies.
    input1 = jax.random.normal(k1, (2, 4, 16, 16), dtype=jnp.float32)  # -> (2, 1024)
    input2 = jax.random.normal(k2, (2, 100), dtype=jnp.float32)        # -> (2, 100), ragged tail

    out = loss_orth(input1, input2)
    jax.block_until_ready(out)

    ref = _loss_orth_ref(input1, input2)
    assert jnp.allclose(out, ref, rtol=1e-3, atol=1e-7), (out, ref)

    # Force small column tiles to exercise multi-block partials + tail masking.
    out_small = loss_orth(input1, input2, block_cols=128)
    jax.block_until_ready(out_small)
    assert jnp.allclose(out_small, ref, rtol=1e-3, atol=1e-7), (out_small, ref)

    print("KERNEL_OK")
</pallas_src>

<mosaic_0001>
module attributes {stable_mosaic.version = 11 : i64} {
  func.func @_gram_kernel(%arg0: i32, %arg1: memref<2x1024xf32, #tpu.memory_space<vmem>>, %arg2: memref<1x2x2xf32, #tpu.memory_space<vmem>>) attributes {dimension_semantics = [#tpu.dimension_semantics<parallel>], iteration_bounds = array<i64: 1>, scalar_prefetch = 0 : i64, scratch_operands = 0 : i64, tpu.core_type = #tpu.core_type<tc>, window_params = [{transform_indices = @transform_0, window_bounds = array<i64: 2, 1024>}, {transform_indices = @transform_1, window_bounds = array<i64: 1, 2, 2>}]} {
    %c0 = arith.constant 0 : index
    %c0_0 = arith.constant 0 : index
    %0 = vector.load %arg1[%c0, %c0_0] : memref<2x1024xf32, #tpu.memory_space<vmem>>, vector<2x1024xf32>
    %c1024_i32 = arith.constant 1024 : i32
    %1 = arith.muli %arg0, %c1024_i32 : i32
    %2 = tpu.iota {dimensions = array<i32: 1>} : vector<2x1024xi32>
    %3 = vector.broadcast %1 : i32 to vector<2x1024xi32>
    %4 = arith.addi %3, %2 : vector<2x1024xi32>
    %c1024_i32_1 = arith.constant 1024 : i32
    %5 = vector.broadcast %c1024_i32_1 : i32 to vector<2x1024xi32>
    %6 = arith.cmpi slt, %4, %5 : vector<2x1024xi32>
    %cst = arith.constant 0.000000e+00 : f32
    %7 = vector.broadcast %cst : f32 to vector<2x1024xf32>
    %8 = arith.select %6, %0, %7 : vector<2x1024xi1>, vector<2x1024xf32>
    %cst_2 = arith.constant dense<0.000000e+00> : vector<2x2xf32>
    %9 = tpu.matmul %8, %8, %cst_2 {dimension_numbers = #tpu.dot_dimension_numbers<[1], [1], [0], [0], [0, 0, 1, 0], [], []>, precision = #tpu.contract_precision<fp32>} : vector<2x1024xf32>, vector<2x1024xf32>, vector<2x2xf32> -> vector<2x2xf32>
    %c0_3 = arith.constant 0 : index
    %c0_4 = arith.constant 0 : index
    %c0_5 = arith.constant 0 : index
    %10 = vector.load %arg2[%c0_3, %c0_4, %c0_5] : memref<1x2x2xf32, #tpu.memory_space<vmem>>, vector<1x2x2xf32>
    %11 = vector.shape_cast %10 : vector<1x2x2xf32> to vector<2x2xf32>
    %12 = vector.shape_cast %9 : vector<2x2xf32> to vector<1x2x2xf32>
    tpu.vector_store %arg2[%c0_3, %c0_4, %c0_5], %12 {strides = array<i32>} : memref<1x2x2xf32, #tpu.memory_space<vmem>>, vector<1x2x2xf32>,
    return
  }
  func.func @transform_0(%arg0: i32) -> (i32, i32) {
    %c0_i32 = arith.constant 0 : i32
    %c0_i32_0 = arith.constant 0 : i32
    return %c0_i32, %arg0 : i32, i32
  }
  func.func @transform_1(%arg0: i32) -> (i32, i32, i32) {
    %c0_i32 = arith.constant 0 : i32
    %c0_i32_0 = arith.constant 0 : i32
    %c0_i32_1 = arith.constant 0 : i32
    return %arg0, %c0_i32, %c0_i32_0 : i32, i32, i32
  }
}

</mosaic_0001>

<bundles_post_ra>
// kernel: tpu_custom_call.1
= control target key start
LH: loop header
LB: loop body
LE: loop exit
PB: predicated region body
PF: predicated region fallthrough
CT: control target
= control target key end

     0   :  { %6 = vsyncpa [#allocation3], 0  ;;  %s2214_s0 = inlined_call_operand.hbm [shape: f32[2,1024], index: 0, kind: input, shape index: {}]   ;;  %s2215_s1 = inlined_call_operand.hbm [shape: f32[1,2,2], index: 1, kind: output, shape index: {}]  }
   0x1   :  { %7 = vsyncpa [#allocation4], 0  ;;  %s2105_s6 = smov [#allocation2]   ;;  %s2057_s10 = scalar_lea.hbm %s2214_s0, 256 }
   0x2   :  { %s14_s7 = sshll.u32 %s2105_s6, 4  ;;  %p2058_p0 = scmp.ne.s32.totalorder %s2214_s0, %s2057_s10  ;;  %s15_s7 = int_to_ptr.vmem [resolvable:$true] %s14_s7 }
   0x3   :  { %p2061_p1 = scmp.lt.u32.totalorder %s2057_s10, %s2214_s0 }
   0x5   :  { %p2063_p2 = pnand %p2061_p1, %p2058_p0 }
   0x7   :  { %2066 = shalt.err (!%p2063_p2)
}
   0x8   :  { %s2067_s15 = scalar_lea.vmem %s15_s7, 256  ;;  %p2072_p4 = scmp.lt.s32.totalorder %s15_s7, %s15_s7 }
   0x9   :  { %p2068_p3 = scmp.ne.s32.totalorder %s15_s7, %s2067_s15  ;;  %p2073_p5 = scmp.lt.s32.totalorder %s2067_s15, %s2067_s15 }
   0xb   :  { %p2074_p6 = por %p2073_p5, %p2072_p4 }
   0xd   :  { %p2075_p7 = pnand %p2074_p6, %p2068_p3 }
   0xf   :  { %2078 = shalt.err (!%p2075_p7)
}
  0x10   :  { %17 = dma.hbm_to_vmem [thread:$0]  %s2214_s0, 256, %s15_s7, [#allocation3]  }
  0x11   :  { %2101 = dma.done.wait [#allocation3], 256  }
  0x12   :  { %2102 = vsyncadd [#allocation3], 4294967040  ;;  %v56_v0 = vlaneseq  ;;  %v2106_v1 = vmov 1983009808   ;;  %v21_v6 = vld [vmem:[#allocation2] sm:$0xff]  ;;  %v22_v7 = vld [vmem:[#allocation2 + $0x8] sm:$0xff] }
  0x13   :  { %v54_v2 = vunpack.c.l.s4 %v2106_v1  ;;  %v52_v32 = vcombine.high %v21_v6, %v21_v6  ;;  %v69_v33 = vcombine.high %v22_v7, %v22_v7  ;;  %s2107_s0 = smov [#allocation5]   ;;  %vm1990_vm0 = vcmask 9216  }
  0x14   :  { %v57_v3 = vshrl.u32 %v56_v0, 7  ;;  %s1998_s18 = sshll.u32 %s2107_s0, 4  ;;  %s1999_s18 = int_to_ptr.vmem [resolvable:$true] %s1998_s18 }
  0x15   :  { %v55_v4 = vunpack.c.0.s8 %v54_v2  ;;  %s2079_s19 = scalar_lea.vmem %s1999_s18, 32  ;;  %p2084_p9 = scmp.lt.s32.totalorder %s1999_s18, %s1999_s18 }
  0x16   :  { %p2080_p8 = scmp.ne.s32.totalorder %s1999_s18, %s2079_s19  ;;  %p2085_p10 = scmp.lt.s32.totalorder %s2079_s19, %s2079_s19 }
  0x17   :  { %v58_v5 = vsub.s32 %v55_v4, %v57_v3 }
  0x18   :  { %p2086_p11 = por %p2085_p10, %p2084_p9 }
  0x19   :  { %v59_v8 = vrot.slane %v21_v6, %v58_v5  ;;  %v76_v9 = vrot.slane %v22_v7, %v58_v5  ;;  %v66_v34 = vrot.slane %v52_v32, %v58_v5  ;;  %v83_v35 = vrot.slane %v69_v33, %v58_v5 }
  0x1a   :  { %p2087_p12 = pnand %p2086_p11, %p2080_p8 }
  0x1b   :  { %v67_v10 = vcombine.high %v59_v8, %v59_v8  ;;  %v84_v11 = vcombine.high %v76_v9, %v76_v9  ;;  %v2130_v12 = vand.u32 4294901760, %v59_v8  ;;  %v2132_v13 = vand.u32 4294901760, %v76_v9 }
  0x1c   :  { %v68_v36 = vcombine.high %v66_v34, %v66_v34  ;;  %v85_v37 = vcombine.high %v83_v35, %v83_v35  ;;  %v2164_v42 = vand.u32 4294901760, %v66_v34  ;;  %v2166_v43 = vand.u32 4294901760, %v83_v35 }
  0x1d   :  { %v2134_v14 = vand.u32 4294901760, %v67_v10  ;;  %v2136_v15 = vand.u32 4294901760, %v84_v11  ;;  %v175_v16 = vsub.f32 %v59_v8, %v2130_v12  ;;  %v1119_v17 = vsub.f32 %v76_v9, %v2132_v13 }
  0x1e   :  { %v2154_v38 = vand.u32 4294901760, %v68_v36  ;;  %v2156_v39 = vand.u32 4294901760, %v85_v37  ;;  %v647_v46 = vsub.f32 %v66_v34, %v2164_v42  ;;  %v1591_v47 = vsub.f32 %v83_v35, %v2166_v43 }
  0x1f   :  { %103 = vmatprep.subr.mxu1 %v2134_v14  ;;  %1047 = vmatprep.subr.mxu0 %v2136_v15  ;;  %v169_v18 = vsub.f32 %v67_v10, %v2134_v14  ;;  %v1113_v19 = vsub.f32 %v84_v11, %v2136_v15  ;;  %v176_v20 = vand.u32 4294901760, %v175_v16  ;;  %v1120_v21 = vand.u32 4294901760, %v1119_v17 }
  0x20   :  { %105 = vmatpush1.xpose.msra.mxu1 %v2130_v12  ;;  %1049 = vmatpush1.xpose.msra.mxu0 %v2132_v13  ;;  %v641_v40 = vsub.f32 %v68_v36, %v2154_v38  ;;  %v1585_v41 = vsub.f32 %v85_v37, %v2156_v39  ;;  %v648_v50 = vand.u32 4294901760, %v647_v46  ;;  %v1592_v51 = vand.u32 4294901760, %v1591_v47 }
  0x21   :  { %v170_v22 = vand.u32 4294901760, %v169_v18  ;;  %v1114_v23 = vand.u32 4294901760, %v1113_v19  ;;  %v177_v24 = vsub.f32 %v175_v16, %v176_v20  ;;  %v1121_v25 = vsub.f32 %v1119_v17, %v1120_v21 }
  0x22   :  { %v642_v44 = vand.u32 4294901760, %v641_v40  ;;  %v1586_v45 = vand.u32 4294901760, %v1585_v41  ;;  %v649_v54 = vsub.f32 %v647_v46, %v648_v50  ;;  %v1593_v55 = vsub.f32 %v1591_v47, %v1592_v51 }
  0x23   :  { %v171_v26 = vsub.f32 %v169_v18, %v170_v22  ;;  %v1115_v27 = vsub.f32 %v1113_v19, %v1114_v23  ;;  %v178_v30 = vand.u32 4294901760, %v177_v24  ;;  %v1122_v31 = vand.u32 4294901760, %v1121_v25 }
  0x24   :  { %v643_v48 = vsub.f32 %v641_v40, %v642_v44  ;;  %v1587_v49 = vsub.f32 %v1585_v41, %v1586_v45  ;;  %v650_v56 = vand.u32 4294901760, %v649_v54  ;;  %v1594_v57 = vand.u32 4294901760, %v1593_v55 }
  0x25   :  { %v172_v28 = vand.u32 4294901760, %v171_v26  ;;  %v1116_v29 = vand.u32 4294901760, %v1115_v27 }
  0x26   :  { %v644_v52 = vand.u32 4294901760, %v643_v48  ;;  %v1588_v53 = vand.u32 4294901760, %v1587_v49 }
  0x27   :  { %173 = vmatprep.mubr.f32.mxu1 %v172_v28  ;;  %189 = vmatprep.subr.mxu1 %v172_v28 }
  0x28   :  { %1117 = vmatprep.mubr.f32.mxu0 %v1116_v29  ;;  %1133 = vmatprep.subr.mxu0 %v1116_v29 }
  0x29   :  { %179 = vmatmul.mubr.f32.vlgmr.msra.gmra.mrb[0].mxu1 %v178_v30  ;;  %1123 = vmatmul.mubr.f32.vlgmr.msra.gmra.mrb[0].mxu0 %v1122_v31 }
  0x2a   :  { %195 = vmatpush1.xpose.msra.mxu1 %v178_v30  ;;  %1139 = vmatpush1.xpose.msra.mxu0 %v1122_v31 }
  0x2b   :  { %259 = vmatprep.mubr.f32.mxu1 %v2134_v14  ;;  %268 = vmatprep.subr.mxu1 %v169_v18 }
  0x2c   :  { %1203 = vmatprep.mubr.f32.mxu0 %v2136_v15  ;;  %1212 = vmatprep.subr.mxu0 %v1113_v19 }
  0x31   :  { %261 = vmatmul.mubr.f32.vlgmr.msra.gmra.mrb[0].mxu1 %v2130_v12  ;;  %1205 = vmatmul.mubr.f32.vlgmr.msra.gmra.mrb[0].mxu0 %v2132_v13 }
  0x32   :  { %271 = vmatpush1.xpose.msra.mxu1 %v175_v16  ;;  %1215 = vmatpush1.xpose.msra.mxu0 %v1119_v17 }
  0x33   :  { %336 = vmatprep.mubr.f32.mxu1 %v169_v18  ;;  %345 = vmatprep.subr.mxu1 %v2134_v14 }
  0x34   :  { %1280 = vmatprep.mubr.f32.mxu0 %v1113_v19  ;;  %1289 = vmatprep.subr.mxu0 %v2136_v15 }
  0x39   :  { %339 = vmatmul.mubr.f32.vlgmr.msra.gmra.mrb[0].mxu1 %v175_v16  ;;  %1283 = vmatmul.mubr.f32.vlgmr.msra.gmra.mrb[0].mxu0 %v1119_v17 }
  0x3a   :  { %347 = vmatpush1.xpose.msra.mxu1 %v2130_v12  ;;  %1291 = vmatpush1.xpose.msra.mxu0 %v2132_v13 }
  0x3b   :  { %413 = vmatprep.mubr.f32.mxu1 %v170_v22  ;;  %425 = vmatprep.subr.mxu1 %v170_v22 }
  0x3c   :  { %1357 = vmatprep.mubr.f32.mxu0 %v1114_v23  ;;  %1369 = vmatprep.subr.mxu0 %v1114_v23 }
  0x41   :  { %417 = vmatmul.mubr.f32.vlgmr.msra.gmra.mrb[0].mxu1 %v176_v20  ;;  %1361 = vmatmul.mubr.f32.vlgmr.msra.gmra.mrb[0].mxu0 %v1120_v21 }
  0x42   :  { %429 = vmatpush1.xpose.msra.mxu1 %v176_v20  ;;  %1373 = vmatpush1.xpose.msra.mxu0 %v1120_v21 }
  0x43   :  { %493 = vmatprep.mubr.f32.mxu1 %v2134_v14  ;;  %501 = vmatprep.subr.mxu1 %v2134_v14 }
  0x44   :  { %1437 = vmatprep.mubr.f32.mxu0 %v2136_v15  ;;  %1445 = vmatprep.subr.mxu0 %v2136_v15 }
  0x49   :  { %495 = vmatmul.mubr.f32.vlgmr.msra.gmra.mrb[0].mxu1 %v2130_v12  ;;  %1439 = vmatmul.mubr.f32.vlgmr.msra.gmra.mrb[0].mxu0 %v2132_v13 }
  0x4a   :  { %503 = vmatpush1.xpose.msra.mxu1 %v2130_v12  ;;  %1447 = vmatpush1.xpose.msra.mxu0 %v2132_v13 }
  0x4b   :  { %567 = vmatprep.mubr.f32.mxu1 %v2134_v14  ;;  %575 = vmatprep.subr.mxu1 %v2154_v38 }
  0x4c   :  { %1511 = vmatprep.mubr.f32.mxu0 %v2136_v15  ;;  %1519 = vmatprep.subr.mxu0 %v2156_v39 }
  0x51   :  { %569 = vmatmul.mubr.f32.vlgmr.msra.gmra.mrb[0].mxu1 %v2130_v12  ;;  %1513 = vmatmul.mubr.f32.vlgmr.msra.gmra.mrb[0].mxu0 %v2132_v13 }
  0x52   :  { %577 = vmatpush1.xpose.msra.mxu1 %v2164_v42  ;;  %1521 = vmatpush1.xpose.msra.mxu0 %v2166_v43 }
  0x53   :  { %645 = vmatprep.mubr.f32.mxu1 %v644_v52  ;;  %661 = vmatprep.subr.mxu1 %v644_v52 }
  0x54   :  { %1589 = vmatprep.mubr.f32.mxu0 %v1588_v53  ;;  %1605 = vmatprep.subr.mxu0 %v1588_v53 }
  0x59   :  { %651 = vmatmul.mubr.f32.vlgmr.msra.gmra.mrb[0].mxu1 %v650_v56  ;;  %1595 = vmatmul.mubr.f32.vlgmr.msra.gmra.mrb[0].mxu0 %v1594_v57 }
  0x5a   :  { %667 = vmatpush1.xpose.msra.mxu1 %v650_v56  ;;  %1611 = vmatpush1.xpose.msra.mxu0 %v1594_v57 }
  0x5b   :  { %731 = vmatprep.mubr.f32.mxu1 %v2154_v38  ;;  %740 = vmatprep.subr.mxu1 %v641_v40 }
  0x5c   :  { %1675 = vmatprep.mubr.f32.mxu0 %v2156_v39  ;;  %1684 = vmatprep.subr.mxu0 %v1585_v41 }
  0x61   :  { %733 = vmatmul.mubr.f32.vlgmr.msra.gmra.mrb[0].mxu1 %v2164_v42  ;;  %1677 = vmatmul.mubr.f32.vlgmr.msra.gmra.mrb[0].mxu0 %v2166_v43 }
  0x62   :  { %743 = vmatpush1.xpose.msra.mxu1 %v647_v46  ;;  %1687 = vmatpush1.xpose.msra.mxu0 %v1591_v47 }
  0x63   :  { %808 = vmatprep.mubr.f32.mxu1 %v641_v40  ;;  %817 = vmatprep.subr.mxu1 %v2154_v38 }
  0x64   :  { %1752 = vmatprep.mubr.f32.mxu0 %v1585_v41  ;;  %1761 = vmatprep.subr.mxu0 %v2156_v39 }
  0x69   :  { %811 = vmatmul.mubr.f32.vlgmr.msra.gmra.mrb[0].mxu1 %v647_v46  ;;  %1755 = vmatmul.mubr.f32.vlgmr.msra.gmra.mrb[0].mxu0 %v1591_v47 }
  0x6a   :  { %819 = vmatpush1.xpose.msra.mxu1 %v2164_v42  ;;  %1763 = vmatpush1.xpose.msra.mxu0 %v2166_v43 }
  0x6b   :  { %885 = vmatprep.mubr.f32.mxu1 %v642_v44  ;;  %897 = vmatprep.subr.mxu1 %v642_v44 }
  0x6c   :  { %1829 = vmatprep.mubr.f32.mxu0 %v1586_v45  ;;  %1841 = vmatprep.subr.mxu0 %v1586_v45 }
  0x71   :  { %889 = vmatmul.mubr.f32.vlgmr.msra.gmra.mrb[0].mxu1 %v648_v50  ;;  %1833 = vmatmul.mubr.f32.vlgmr.msra.gmra.mrb[0].mxu0 %v1592_v51 }
  0x72   :  { %901 = vmatpush1.xpose.msra.mxu1 %v648_v50  ;;  %1845 = vmatpush1.xpose.msra.mxu0 %v1592_v51 }
  0x73   :  { %965 = vmatprep.mubr.f32.mxu1 %v2154_v38  ;;  %973 = vmatprep.subr.mxu1 %v2154_v38 }
  0x74   :  { %1909 = vmatprep.mubr.f32.mxu0 %v2156_v39  ;;  %1917 = vmatprep.subr.mxu0 %v2156_v39 }
  0x79   :  { %967 = vmatmul.mubr.f32.vlgmr.msra.gmra.mrb[0].mxu1 %v2164_v42  ;;  %1911 = vmatmul.mubr.f32.vlgmr.msra.gmra.mrb[0].mxu0 %v2166_v43 }
  0x7a   :  { %975 = vmatpush1.xpose.msra.mxu1 %v2164_v42  ;;  %1919 = vmatpush1.xpose.msra.mxu0 %v2166_v43 }
  0x7b   :  { %1039 = vmatprep.mubr.f32.mxu1 %v2154_v38  ;;  %1983 = vmatprep.mubr.f32.mxu0 %v2156_v39 }
  0x81   :  { %1041 = vmatmul.mubr.f32.vlgmr.msra.gmra.mrb[0].mxu1 %v2164_v42  ;;  %1985 = vmatmul.mubr.f32.vlgmr.msra.gmra.mrb[0].mxu0 %v2166_v43 }
 0x154   :  { %v1042_v58 = vpop.f32.mrb[0].mxu1  ;;  %v1986_v59 = vpop.f32.mrb[0].mxu0 }
 0x155   :  { %v2007_v60 = vadd.f32 %v1986_v59, %v1042_v58  ;;  %v1044_v61 = vpop.f32.mrb[1].mxu1  ;;  %v1988_v62 = vpop.f32.mrb[1].mxu0 }
 0x157   :  { %1991 = vst.msk [vmem:[#allocation5] sm:$0x3] %vm1990_vm0, %v2007_v60 }
 0x158   :  { %2090 = shalt.err (!%p2087_p12)
}
 0x159   :  { %s2091_s22 = scalar_lea.hbm %s2215_s1, 32 }
 0x15a   :  { %p2092_p13 = scmp.ne.s32.totalorder %s2215_s1, %s2091_s22  ;;  %p2095_p0 = scmp.lt.u32.totalorder %s2091_s22, %s2215_s1 }
 0x15c   :  { %p2097_p1 = pnand %p2095_p0, %p2092_p13 }
 0x15e   :  { %2100 = shalt.err (!%p2097_p1)
}
 0x15f   :  { %2001 = dma.vmem_to_hbm [thread:$0]  %s1999_s18, 32, %s2215_s1, [#allocation4]  }
 0x160   :  { %2103 = dma.done.wait [#allocation4], 32  }
 0x161   :  { %2104 = vsyncadd [#allocation4], 4294967264 }
 0x162   :  { %2005 = vsyncpa [#allocation3], 1 }
 0x163   :  { %2006 = vsyncpa [#allocation4], 1 }

</bundles_post_ra>
